<compile_context>
chip_gen: v6e
topology: v6e:2x2x1
jax: 0.10.0
libtpu: 0.0.40
codegen_flags: <defaults>
</compile_context>

<pallas_src>
import jax
import jax.numpy as jnp
from jax import lax
from jax.experimental import pallas as pl
from jax.experimental.pallas import tpu as pltpu

NEG_SLOPE = 0.2  # LeakyReLU(0.2)


def _radial_field_kernel(row_lane_ref, row_sub_ref, col_lane_ref,
                         x_ref, vel_norm_ref, vel_ref,
                         wp1_ref, bp1_ref, wp2_ref,
                         wv1_ref, bv1_ref, wv2_ref, bv2_ref,
                         out_ref, agg_ref):
    f32 = jnp.float32
    step = pl.program_id(0)
    last = pl.num_programs(0) - 1

    @pl.when(step == 0)
    def _init():
        agg_ref[...] = jnp.zeros_like(agg_ref)

    x_aug = x_ref[...].astype(f32)                     # [D+1, N], row D is zeros
    D1, N = x_aug.shape
    D = D1 - 1
    TE = row_lane_ref.shape[1]

    # --- gather selector: nodes on sublanes, edges on lanes ---------------------
    row_lane = row_lane_ref[...]                       # [1, TE] int32
    col_lane = col_lane_ref[...]                       # [1, TE] int32
    node_nt = lax.broadcasted_iota(jnp.int32, (N, TE), 0)
    diff_sel = ((row_lane == node_nt).astype(f32)
                - (col_lane == node_nt).astype(f32))   # [N, TE], values {-1,0,1}
    # padded edges use sentinel index N -> all-zero selector column -> x_diff = 0

    # fused gather: x[row] - x[col], canonical matmul, no transposes
    x_diff = jnp.dot(x_aug, diff_sel, preferred_element_type=f32)      # [D+1, TE]

    # --- edge_model: radial distance + phi MLP (edge-on-lanes, full VPU width) --
    radial = jnp.sqrt(jnp.sum(x_diff * x_diff, axis=0, keepdims=True))  # [1, TE]
    h = wp1_ref[...] * radial + bp1_ref[...]                            # [H, TE]
    h = jnp.where(h > 0, h, NEG_SLOPE * h)                              # LeakyReLU
    e_out = jnp.tanh(jnp.sum(h * wp2_ref[...], axis=0, keepdims=True))  # [1, TE]

    # m_aug: rows [0, D) hold m_ij = x_diff * e_out, row D holds 1 (edge count).
    sub_ids = lax.broadcasted_iota(jnp.int32, (D1, TE), 0)
    m_aug = jnp.where(sub_ids == D, 1.0, x_diff * e_out)                # [D+1, TE]

    # --- scatter selector: edges on sublanes, nodes on lanes --------------------
    node_en = lax.broadcasted_iota(jnp.int32, (TE, N), 1)
    onehot_row = (row_sub_ref[...] == node_en).astype(f32)              # [TE, N]
    # padded edges (sentinel N) -> all-zero one-hot row -> contribute nothing

    # scatter-sum + counts in ONE canonical matmul (no transposes)
    agg_ref[...] += jnp.dot(m_aug, onehot_row, preferred_element_type=f32)  # [D+1, N]

    # --- finalize: segment mean, node update, velocity branch -------------------
    @pl.when(step == last)
    def _finalize():
        acc = agg_ref[...]                             # [D+1, N]
        counts = jnp.maximum(acc[D:, :], 1.0)          # [1, N]
        agg = acc[:D, :] / counts                      # segment mean, [D, N]
        x_node = x_aug[:D, :] + agg                    # [D, N]

        vnorm = vel_norm_ref[...].astype(f32)          # [1, N]
        hv = wv1_ref[...] * vnorm + bv1_ref[...]       # [H, N]
        hv = jnp.where(hv > 0, hv, NEG_SLOPE * hv)
        scale = jnp.sum(hv * wv2_ref[...], axis=0, keepdims=True) + bv2_ref[...]  # [1, N]

        out_ref[...] = (x_node + vel_ref[...].astype(f32) * scale).astype(out_ref.dtype)


def _round_up(a, m):
    return ((a + m - 1) // m) * m


def _vmem_limit_bytes():
    """Per-generation VMEM budget: 128 MiB parts (v5e/v6e) vs 64 MiB (v7x)."""
    try:
        cap = int(pltpu.get_tpu_info().vmem_capacity_bytes)
    except Exception:
        cap = 64 * 1024 * 1024                          # conservative (v7x per-TC)
    return int(min(cap * 3 // 4, 100 * 1024 * 1024))


def _pick_edge_tile(n_nodes, n_edges, vmem_limit):
    """Biggest edge tile whose ~6 live selector/iota slabs fit in half the budget."""
    n_lane = _round_up(max(n_nodes, 1), 128)   # [TE, N] slabs pad lanes to 128
    n_sub = _round_up(max(n_nodes, 1), 8)      # [N, TE] slabs pad sublanes to 8
    bytes_per_edge = 4 * (2 * n_lane + 4 * n_sub)
    tile = (vmem_limit // 2) // max(1, bytes_per_edge)
    tile = max(128, (tile // 128) * 128)
    tile = min(tile, max(128, _round_up(n_edges, 128)))
    return int(tile)


def radial_field_layer(x, vel_norm, vel, edge_index, params,
                       edge_attr=None, edge_tile=None):
    """Pallas wrapper reproducing RadialFieldLayer.forward. Returns (x_new, edge_attr)."""
    row, col = edge_index
    N, D = x.shape
    E = int(row.shape[0])
    H = params["wp1"].shape[1]
    f32 = jnp.float32

    # Column-layout ([H, 1]) weights for the lanes-dense broadcast-multiply MLPs.
    wp1_c = params["wp1"].reshape(H, 1).astype(f32)
    bp1_c = params["bp1"].reshape(H, 1).astype(f32)
    wp2_c = params["wp2"].reshape(H, 1).astype(f32)
    wv1_c = params["wv1"].reshape(H, 1).astype(f32)
    bv1_c = params["bv1"].reshape(H, 1).astype(f32)
    wv2_c = params["wv2"].reshape(H, 1).astype(f32)
    bv2 = params["bv2"].reshape(1, 1).astype(f32)

    if E == 0:
        # No edges: agg == 0, only the velocity branch contributes.
        hv = vel_norm.astype(f32) @ params["wv1"] + params["bv1"]
        hv = jnp.where(hv > 0, hv, NEG_SLOPE * hv)
        scale = hv @ params["wv2"] + params["bv2"]
        return (x.astype(f32) + vel.astype(f32) * scale).astype(x.dtype), edge_attr

    vmem_limit = _vmem_limit_bytes()
    if edge_tile is None:
        edge_tile = _pick_edge_tile(N, E, vmem_limit)
    edge_tile = int(max(128, (int(edge_tile) // 128) * 128))

    n_steps = pl.cdiv(E, edge_tile)
    e_pad = n_steps * edge_tile

    row_i = row.astype(jnp.int32)
    col_i = col.astype(jnp.int32)
    if e_pad > E:
        pad = jnp.full((e_pad - E,), N, jnp.int32)      # sentinel -> zero one-hot
        row_i = jnp.concatenate([row_i, pad])
        col_i = jnp.concatenate([col_i, pad])

    # Row index streamed in both layouts so neither selector needs a transpose.
    row_lane = row_i.reshape(1, e_pad)
    col_lane = col_i.reshape(1, e_pad)
    row_sub = row_i.reshape(e_pad, 1)

    # x transposed to [D, N] plus a zero row: row D of m carries the edge count.
    x_aug_t = jnp.concatenate([x.astype(f32).T, jnp.zeros((1, N), f32)], axis=0)
    vel_norm_t = vel_norm.astype(f32).reshape(N, 1).T   # [1, N]
    vel_t = vel.astype(f32).T                           # [D, N]

    def whole(arr):
        ndim = arr.ndim

        def imap(e):
            return (0,) * ndim

        return pl.BlockSpec(arr.shape, imap)

    in_specs = [
        pl.BlockSpec((1, edge_tile), lambda e: (0, e)),   # row (edges on lanes)
        pl.BlockSpec((edge_tile, 1), lambda e: (e, 0)),   # row (edges on sublanes)
        pl.BlockSpec((1, edge_tile), lambda e: (0, e)),   # col (edges on lanes)
        whole(x_aug_t), whole(vel_norm_t), whole(vel_t),
        whole(wp1_c), whole(bp1_c), whole(wp2_c),
        whole(wv1_c), whole(bv1_c), whole(wv2_c), whole(bv2),
    ]

    out_t = pl.pallas_call(
        _radial_field_kernel,
        out_shape=jax.ShapeDtypeStruct((D, N), x.dtype),
        grid_spec=pltpu.PrefetchScalarGridSpec(
            num_scalar_prefetch=0,
            grid=(n_steps,),
            in_specs=in_specs,
            out_specs=pl.BlockSpec((D, N), lambda e: (0, 0)),
            scratch_shapes=[pltpu.VMEM((D + 1, N), jnp.float32)],
        ),
        compiler_params=pltpu.CompilerParams(
            # Edge axis is a sequential reduction into the shared agg scratch:
            # it MUST stay "arbitrary" (a "parallel" flip would race the scratch).
            dimension_semantics=("arbitrary",),
            vmem_limit_bytes=vmem_limit,
        ),
    )(row_lane, row_sub, col_lane, x_aug_t, vel_norm_t, vel_t,
      wp1_c, bp1_c, wp2_c, wv1_c, bv1_c, wv2_c, bv2)

    return out_t.T, edge_attr


def init_params(key, hidden_nf=32, edge_attr_nf=0):
    """Deterministic synthetic init mirroring the PyTorch module's shapes."""
    ks = jax.random.split(key, 4)

    def linear_init(k, fan_in, fan_out):
        bound = 1.0 / jnp.sqrt(jnp.float32(fan_in))
        kw, kb = jax.random.split(k)
        w = jax.random.uniform(kw, (fan_in, fan_out), jnp.float32, -bound, bound)
        b = jax.random.uniform(kb, (1, fan_out), jnp.float32, -bound, bound)
        return w, b

    # coord_mlp_vel: Linear(1, H) -> LeakyReLU -> Linear(H, 1)
    wv1, bv1 = linear_init(ks[0], 1, hidden_nf)
    wv2, bv2 = linear_init(ks[1], hidden_nf, 1)
    # phi: Linear(1+edge_attr_nf, H) -> LeakyReLU -> Linear(H, 1, bias=False) -> Tanh
    wp1, bp1 = linear_init(ks[2], 1 + edge_attr_nf, hidden_nf)
    gain = 0.001  # xavier_uniform_(gain=0.001)
    limit = gain * jnp.sqrt(6.0 / jnp.float32(hidden_nf + 1))
    wp2 = jax.random.uniform(ks[3], (hidden_nf, 1), jnp.float32, -limit, limit)

    return dict(wp1=wp1, bp1=bp1, wp2=wp2, wv1=wv1, bv1=bv1, wv2=wv2, bv2=bv2)


def reference(x, vel_norm, vel, edge_index, params):
    """Pure-JAX reference matching the PyTorch forward semantics."""
    row, col = edge_index
    x_diff = x[row] - x[col]
    radial = jnp.sqrt(jnp.sum(x_diff ** 2, axis=1, keepdims=True))
    h = radial @ params["wp1"] + params["bp1"]
    h = jnp.where(h > 0, h, NEG_SLOPE * h)
    e_out = jnp.tanh(h @ params["wp2"])
    m_ij = x_diff * e_out
    N = x.shape[0]
    agg_sum = jnp.zeros((N, x.shape[1]), x.dtype).at[row].add(m_ij)
    counts = jnp.zeros((N, 1), x.dtype).at[row].add(1.0)
    agg = agg_sum / jnp.maximum(counts, 1.0)          # unsorted_segment_mean (count >= 1)
    x_node = x + agg
    hv = vel_norm @ params["wv1"] + params["bv1"]
    hv = jnp.where(hv > 0, hv, NEG_SLOPE * hv)
    scale = hv @ params["wv2"] + params["bv2"]
    return x_node + vel * scale


if __name__ == "__main__":
    key = jax.random.PRNGKey(0)
    k_x, k_v, k_e, k_p = jax.random.split(key, 4)

    # Small shapes; E=300 with edge_tile=128 -> 3 grid steps + padded tail edges.
    N, D, E, HIDDEN = 16, 3, 300, 32
    x = jax.random.normal(k_x, (N, D), jnp.float32)
    vel = jax.random.normal(k_v, (N, D), jnp.float32)
    vel_norm = jnp.sqrt(jnp.sum(vel ** 2, axis=1, keepdims=True))

    k_r, k_c = jax.random.split(k_e)
    row = jax.random.randint(k_r, (E,), 0, N, jnp.int32)
    col = jax.random.randint(k_c, (E,), 0, N, jnp.int32)
    edge_index = (row, col)

    params = init_params(k_p, hidden_nf=HIDDEN, edge_attr_nf=0)

    x_new, edge_attr_out = radial_field_layer(x, vel_norm, vel, edge_index, params,
                                              edge_tile=128)
    x_new = jax.block_until_ready(x_new)

    x_ref = reference(x, vel_norm, vel, edge_index, params)
    assert edge_attr_out is None
    assert jnp.allclose(x_new, x_ref, atol=1e-5, rtol=1e-5), (
        f"max abs err {jnp.max(jnp.abs(x_new - x_ref))}")

    print("KERNEL_OK")
</pallas_src>

<mosaic_0001>
module attributes {stable_mosaic.version = 11 : i64} {
  func.func @_radial_field_kernel(%arg0: i32, %arg1: memref<1x128xi32, #tpu.memory_space<vmem>>, %arg2: memref<128x1xi32, #tpu.memory_space<vmem>>, %arg3: memref<1x128xi32, #tpu.memory_space<vmem>>, %arg4: memref<4x16xf32, #tpu.memory_space<vmem>>, %arg5: memref<1x16xf32, #tpu.memory_space<vmem>>, %arg6: memref<3x16xf32, #tpu.memory_space<vmem>>, %arg7: memref<32x1xf32, #tpu.memory_space<vmem>>, %arg8: memref<32x1xf32, #tpu.memory_space<vmem>>, %arg9: memref<32x1xf32, #tpu.memory_space<vmem>>, %arg10: memref<32x1xf32, #tpu.memory_space<vmem>>, %arg11: memref<32x1xf32, #tpu.memory_space<vmem>>, %arg12: memref<32x1xf32, #tpu.memory_space<vmem>>, %arg13: memref<1x1xf32, #tpu.memory_space<vmem>>, %arg14: memref<3x16xf32, #tpu.memory_space<vmem>>, %arg15: memref<4x16xf32, #tpu.memory_space<vmem>>) attributes {dimension_semantics = [#tpu.dimension_semantics<arbitrary>], iteration_bounds = array<i64: 3>, scalar_prefetch = 0 : i64, scratch_operands = 1 : i64, tpu.core_type = #tpu.core_type<tc>, window_params = [{transform_indices = @transform_0, window_bounds = array<i64: 1, 128>}, {transform_indices = @transform_1, window_bounds = array<i64: 128, 1>}, {transform_indices = @transform_2, window_bounds = array<i64: 1, 128>}, {pipeline_mode = #tpu.pipeline_mode<synchronous>, transform_indices = @transform_3, window_bounds = array<i64: 4, 16>}, {pipeline_mode = #tpu.pipeline_mode<synchronous>, transform_indices = @transform_4, window_bounds = array<i64: 1, 16>}, {pipeline_mode = #tpu.pipeline_mode<synchronous>, transform_indices = @transform_5, window_bounds = array<i64: 3, 16>}, {pipeline_mode = #tpu.pipeline_mode<synchronous>, transform_indices = @transform_6, window_bounds = array<i64: 32, 1>}, {pipeline_mode = #tpu.pipeline_mode<synchronous>, transform_indices = @transform_7, window_bounds = array<i64: 32, 1>}, {pipeline_mode = #tpu.pipeline_mode<synchronous>, transform_indices = @transform_8, window_bounds = array<i64: 32, 1>}, {pipeline_mode = #tpu.pipeline_mode<synchronous>, transform_indices = @transform_9, window_bounds = array<i64: 32, 1>}, {pipeline_mode = #tpu.pipeline_mode<synchronous>, transform_indices = @transform_10, window_bounds = array<i64: 32, 1>}, {pipeline_mode = #tpu.pipeline_mode<synchronous>, transform_indices = @transform_11, window_bounds = array<i64: 32, 1>}, {pipeline_mode = #tpu.pipeline_mode<synchronous>, transform_indices = @transform_12, window_bounds = array<i64: 1, 1>}, {pipeline_mode = #tpu.pipeline_mode<synchronous>, transform_indices = @transform_13, window_bounds = array<i64: 3, 16>}]} {
    %c0_i32 = arith.constant 0 : i32
    %0 = arith.cmpi eq, %arg0, %c0_i32 : i32
    %1 = arith.extui %0 : i1 to i32
    %c0_i32_0 = arith.constant 0 : i32
    %2 = arith.cmpi ne, %1, %c0_i32_0 : i32
    scf.if %2 {
      %cst_25 = arith.constant 0.000000e+00 : f32
      %59 = vector.broadcast %cst_25 : f32 to vector<4x16xf32>
      %c0_26 = arith.constant 0 : index
      %c0_27 = arith.constant 0 : index
      %60 = vector.load %arg15[%c0_26, %c0_27] : memref<4x16xf32, #tpu.memory_space<vmem>>, vector<4x16xf32>
      tpu.vector_store %arg15[%c0_26, %c0_27], %59 {strides = array<i32>} : memref<4x16xf32, #tpu.memory_space<vmem>>, vector<4x16xf32>,
    } else {
    }
    %c0 = arith.constant 0 : index
    %c0_1 = arith.constant 0 : index
    %3 = vector.load %arg4[%c0, %c0_1] : memref<4x16xf32, #tpu.memory_space<vmem>>, vector<4x16xf32>
    %c0_2 = arith.constant 0 : index
    %c0_3 = arith.constant 0 : index
    %4 = vector.load %arg1[%c0_2, %c0_3] : memref<1x128xi32, #tpu.memory_space<vmem>>, vector<1x128xi32>
    %c0_4 = arith.constant 0 : index
    %c0_5 = arith.constant 0 : index
    %5 = vector.load %arg3[%c0_4, %c0_5] : memref<1x128xi32, #tpu.memory_space<vmem>>, vector<1x128xi32>
    %6 = tpu.iota {dimensions = array<i32: 0>} : vector<16x128xi32>
    %7 = vector.broadcast %4 : vector<1x128xi32> to vector<16x128xi32>
    %8 = arith.cmpi eq, %7, %6 : vector<16x128xi32>
    %9 = arith.extui %8 : vector<16x128xi1> to vector<16x128xi32>
    %10 = arith.sitofp %9 : vector<16x128xi32> to vector<16x128xf32>
    %11 = vector.broadcast %5 : vector<1x128xi32> to vector<16x128xi32>
    %12 = arith.cmpi eq, %11, %6 : vector<16x128xi32>
    %13 = arith.extui %12 : vector<16x128xi1> to vector<16x128xi32>
    %14 = arith.sitofp %13 : vector<16x128xi32> to vector<16x128xf32>
    %15 = arith.subf %10, %14 : vector<16x128xf32>
    %cst = arith.constant dense<0.000000e+00> : vector<4x128xf32>
    %16 = tpu.matmul %3, %15, %cst {dimension_numbers = #tpu.dot_dimension_numbers<[1], [0], [0], [1], [0, 0, 1, 1], [], []>} : vector<4x16xf32>, vector<16x128xf32>, vector<4x128xf32> -> vector<4x128xf32>
    %17 = arith.mulf %16, %16 : vector<4x128xf32>
    %cst_6 = arith.constant dense<0.000000e+00> : vector<128xf32>
    %18 = vector.multi_reduction <add>, %17, %cst_6 [0] : vector<4x128xf32> to vector<128xf32>
    %19 = vector.shape_cast %18 : vector<128xf32> to vector<1x128xf32>
    %20 = math.sqrt %19 : vector<1x128xf32>
    %c0_7 = arith.constant 0 : index
    %c0_8 = arith.constant 0 : index
    %21 = vector.load %arg7[%c0_7, %c0_8] : memref<32x1xf32, #tpu.memory_space<vmem>>, vector<32x1xf32>
    %22 = vector.broadcast %21 : vector<32x1xf32> to vector<32x128xf32>
    %23 = vector.broadcast %20 : vector<1x128xf32> to vector<32x128xf32>
    %24 = arith.mulf %22, %23 : vector<32x128xf32>
    %c0_9 = arith.constant 0 : index
    %c0_10 = arith.constant 0 : index
    %25 = vector.load %arg8[%c0_9, %c0_10] : memref<32x1xf32, #tpu.memory_space<vmem>>, vector<32x1xf32>
    %26 = vector.broadcast %25 : vector<32x1xf32> to vector<32x128xf32>
    %27 = arith.addf %24, %26 : vector<32x128xf32>
    %cst_11 = arith.constant 0.000000e+00 : f32
    %28 = vector.broadcast %cst_11 : f32 to vector<32x128xf32>
    %29 = arith.cmpf ogt, %27, %28 : vector<32x128xf32>
    %cst_12 = arith.constant 2.000000e-01 : f32
    %30 = vector.broadcast %cst_12 : f32 to vector<32x128xf32>
    %31 = arith.mulf %30, %27 : vector<32x128xf32>
    %32 = arith.select %29, %27, %31 : vector<32x128xi1>, vector<32x128xf32>
    %c0_13 = arith.constant 0 : index
    %c0_14 = arith.constant 0 : index
    %33 = vector.load %arg9[%c0_13, %c0_14] : memref<32x1xf32, #tpu.memory_space<vmem>>, vector<32x1xf32>
    %34 = vector.broadcast %33 : vector<32x1xf32> to vector<32x128xf32>
    %35 = arith.mulf %32, %34 : vector<32x128xf32>
    %cst_15 = arith.constant dense<0.000000e+00> : vector<128xf32>
    %36 = vector.multi_reduction <add>, %35, %cst_15 [0] : vector<32x128xf32> to vector<128xf32>
    %37 = vector.shape_cast %36 : vector<128xf32> to vector<1x128xf32>
    %38 = math.tanh %37 : vector<1x128xf32>
    %39 = tpu.iota {dimensions = array<i32: 0>} : vector<4x128xi32>
    %c3_i32 = arith.constant 3 : i32
    %40 = vector.broadcast %c3_i32 : i32 to vector<4x128xi32>
    %41 = arith.cmpi eq, %39, %40 : vector<4x128xi32>
    %42 = vector.broadcast %38 : vector<1x128xf32> to vector<4x128xf32>
    %43 = arith.mulf %16, %42 : vector<4x128xf32>
    %cst_16 = arith.constant 1.000000e+00 : f32
    %44 = vector.broadcast %cst_16 : f32 to vector<4x128xf32>
    %45 = arith.select %41, %44, %43 : vector<4x128xi1>, vector<4x128xf32>
    %46 = tpu.iota {dimensions = array<i32: 1>} : vector<128x16xi32>
    %c0_17 = arith.constant 0 : index
    %c0_18 = arith.constant 0 : index
    %47 = vector.load %arg2[%c0_17, %c0_18] : memref<128x1xi32, #tpu.memory_space<vmem>>, vector<128x1xi32>
    %48 = vector.broadcast %47 : vector<128x1xi32> to vector<128x16xi32>
    %49 = arith.cmpi eq, %48, %46 : vector<128x16xi32>
    %50 = arith.extui %49 : vector<128x16xi1> to vector<128x16xi32>
    %51 = arith.sitofp %50 : vector<128x16xi32> to vector<128x16xf32>
    %c0_19 = arith.constant 0 : index
    %c0_20 = arith.constant 0 : index
    %52 = vector.load %arg15[%c0_19, %c0_20] : memref<4x16xf32, #tpu.memory_space<vmem>>, vector<4x16xf32>
    %cst_21 = arith.constant dense<0.000000e+00> : vector<4x16xf32>
    %53 = tpu.matmul %45, %51, %cst_21 {dimension_numbers = #tpu.dot_dimension_numbers<[1], [0], [0], [1], [0, 0, 1, 1], [], []>} : vector<4x128xf32>, vector<128x16xf32>, vector<4x16xf32> -> vector<4x16xf32>
    %54 = arith.addf %52, %53 : vector<4x16xf32>
    %c0_22 = arith.constant 0 : index
    %c0_23 = arith.constant 0 : index
    %55 = vector.load %arg15[%c0_22, %c0_23] : memref<4x16xf32, #tpu.memory_space<vmem>>, vector<4x16xf32>
    tpu.vector_store %arg15[%c0_22, %c0_23], %54 {strides = array<i32>} : memref<4x16xf32, #tpu.memory_space<vmem>>, vector<4x16xf32>,
    %c2_i32 = arith.constant 2 : i32
    %56 = arith.cmpi eq, %arg0, %c2_i32 : i32
    %57 = arith.extui %56 : i1 to i32
    %c0_i32_24 = arith.constant 0 : i32
    %58 = arith.cmpi ne, %57, %c0_i32_24 : i32
    scf.if %58 {
      %c0_25 = arith.constant 0 : index
      %c0_26 = arith.constant 0 : index
      %59 = vector.load %arg15[%c0_25, %c0_26] : memref<4x16xf32, #tpu.memory_space<vmem>>, vector<4x16xf32>
      %60 = vector.extract_strided_slice %59 {offsets = [3, 0], sizes = [1, 16], strides = [1, 1]} : vector<4x16xf32> to vector<1x16xf32>
      %cst_27 = arith.constant 1.000000e+00 : f32
      %61 = vector.broadcast %cst_27 : f32 to vector<1x16xf32>
      %62 = arith.maximumf %60, %61 : vector<1x16xf32>
      %63 = vector.extract_strided_slice %59 {offsets = [0, 0], sizes = [3, 16], strides = [1, 1]} : vector<4x16xf32> to vector<3x16xf32>
      %64 = vector.broadcast %62 : vector<1x16xf32> to vector<3x16xf32>
      %65 = arith.divf %63, %64 : vector<3x16xf32>
      %66 = vector.extract_strided_slice %3 {offsets = [0, 0], sizes = [3, 16], strides = [1, 1]} : vector<4x16xf32> to vector<3x16xf32>
      %67 = arith.addf %66, %65 : vector<3x16xf32>
      %c0_28 = arith.constant 0 : index
      %c0_29 = arith.constant 0 : index
      %68 = vector.load %arg5[%c0_28, %c0_29] : memref<1x16xf32, #tpu.memory_space<vmem>>, vector<1x16xf32>
      %c0_30 = arith.constant 0 : index
      %c0_31 = arith.constant 0 : index
      %69 = vector.load %arg10[%c0_30, %c0_31] : memref<32x1xf32, #tpu.memory_space<vmem>>, vector<32x1xf32>
      %70 = vector.broadcast %69 : vector<32x1xf32> to vector<32x16xf32>
      %71 = vector.broadcast %68 : vector<1x16xf32> to vector<32x16xf32>
      %72 = arith.mulf %70, %71 : vector<32x16xf32>
      %c0_32 = arith.constant 0 : index
      %c0_33 = arith.constant 0 : index
      %73 = vector.load %arg11[%c0_32, %c0_33] : memref<32x1xf32, #tpu.memory_space<vmem>>, vector<32x1xf32>
      %74 = vector.broadcast %73 : vector<32x1xf32> to vector<32x16xf32>
      %75 = arith.addf %72, %74 : vector<32x16xf32>
      %cst_34 = arith.constant 0.000000e+00 : f32
      %76 = vector.broadcast %cst_34 : f32 to vector<32x16xf32>
      %77 = arith.cmpf ogt, %75, %76 : vector<32x16xf32>
      %cst_35 = arith.constant 2.000000e-01 : f32
      %78 = vector.broadcast %cst_35 : f32 to vector<32x16xf32>
      %79 = arith.mulf %78, %75 : vector<32x16xf32>
      %80 = arith.select %77, %75, %79 : vector<32x16xi1>, vector<32x16xf32>
      %c0_36 = arith.constant 0 : index
      %c0_37 = arith.constant 0 : index
      %81 = vector.load %arg12[%c0_36, %c0_37] : memref<32x1xf32, #tpu.memory_space<vmem>>, vector<32x1xf32>
      %82 = vector.broadcast %81 : vector<32x1xf32> to vector<32x16xf32>
      %83 = arith.mulf %80, %82 : vector<32x16xf32>
      %cst_38 = arith.constant dense<0.000000e+00> : vector<16xf32>
      %84 = vector.multi_reduction <add>, %83, %cst_38 [0] : vector<32x16xf32> to vector<16xf32>
      %85 = vector.shape_cast %84 : vector<16xf32> to vector<1x16xf32>
      %c0_39 = arith.constant 0 : index
      %c0_40 = arith.constant 0 : index
      %86 = vector.load %arg13[%c0_39, %c0_40] : memref<1x1xf32, #tpu.memory_space<vmem>>, vector<1x1xf32>
      %87 = vector.broadcast %86 : vector<1x1xf32> to vector<1x16xf32>
      %88 = arith.addf %85, %87 : vector<1x16xf32>
      %c0_41 = arith.constant 0 : index
      %c0_42 = arith.constant 0 : index
      %89 = vector.load %arg6[%c0_41, %c0_42] : memref<3x16xf32, #tpu.memory_space<vmem>>, vector<3x16xf32>
      %90 = vector.broadcast %88 : vector<1x16xf32> to vector<3x16xf32>
      %91 = arith.mulf %89, %90 : vector<3x16xf32>
      %92 = arith.addf %67, %91 : vector<3x16xf32>
      %c0_43 = arith.constant 0 : index
      %c0_44 = arith.constant 0 : index
      %93 = vector.load %arg14[%c0_43, %c0_44] : memref<3x16xf32, #tpu.memory_space<vmem>>, vector<3x16xf32>
      tpu.vector_store %arg14[%c0_43, %c0_44], %92 {strides = array<i32>} : memref<3x16xf32, #tpu.memory_space<vmem>>, vector<3x16xf32>,
    } else {
    }
    return
  }
  func.func @transform_0(%arg0: i32) -> (i32, i32) {
    %c0_i32 = arith.constant 0 : i32
    %c0_i32_0 = arith.constant 0 : i32
    return %c0_i32, %arg0 : i32, i32
  }
  func.func @transform_1(%arg0: i32) -> (i32, i32) {
    %c0_i32 = arith.constant 0 : i32
    %c0_i32_0 = arith.constant 0 : i32
    return %arg0, %c0_i32 : i32, i32
  }
  func.func @transform_2(%arg0: i32) -> (i32, i32) {
    %c0_i32 = arith.constant 0 : i32
    %c0_i32_0 = arith.constant 0 : i32
    return %c0_i32, %arg0 : i32, i32
  }
  func.func @transform_3(%arg0: i32) -> (i32, i32) {
    %c0_i32 = arith.constant 0 : i32
    %c0_i32_0 = arith.constant 0 : i32
    %c0_i32_1 = arith.constant 0 : i32
    return %c0_i32, %c0_i32_0 : i32, i32
  }
  func.func @transform_4(%arg0: i32) -> (i32, i32) {
    %c0_i32 = arith.constant 0 : i32
    %c0_i32_0 = arith.constant 0 : i32
    %c0_i32_1 = arith.constant 0 : i32
    return %c0_i32, %c0_i32_0 : i32, i32
  }
  func.func @transform_5(%arg0: i32) -> (i32, i32) {
    %c0_i32 = arith.constant 0 : i32
    %c0_i32_0 = arith.constant 0 : i32
    %c0_i32_1 = arith.constant 0 : i32
    return %c0_i32, %c0_i32_0 : i32, i32
  }
  func.func @transform_6(%arg0: i32) -> (i32, i32) {
    %c0_i32 = arith.constant 0 : i32
    %c0_i32_0 = arith.constant 0 : i32
    %c0_i32_1 = arith.constant 0 : i32
    return %c0_i32, %c0_i32_0 : i32, i32
  }
  func.func @transform_7(%arg0: i32) -> (i32, i32) {
    %c0_i32 = arith.constant 0 : i32
    %c0_i32_0 = arith.constant 0 : i32
    %c0_i32_1 = arith.constant 0 : i32
    return %c0_i32, %c0_i32_0 : i32, i32
  }
  func.func @transform_8(%arg0: i32) -> (i32, i32) {
    %c0_i32 = arith.constant 0 : i32
    %c0_i32_0 = arith.constant 0 : i32
    %c0_i32_1 = arith.constant 0 : i32
    return %c0_i32, %c0_i32_0 : i32, i32
  }
  func.func @transform_9(%arg0: i32) -> (i32, i32) {
    %c0_i32 = arith.constant 0 : i32
    %c0_i32_0 = arith.constant 0 : i32
    %c0_i32_1 = arith.constant 0 : i32
    return %c0_i32, %c0_i32_0 : i32, i32
  }
  func.func @transform_10(%arg0: i32) -> (i32, i32) {
    %c0_i32 = arith.constant 0 : i32
    %c0_i32_0 = arith.constant 0 : i32
    %c0_i32_1 = arith.constant 0 : i32
    return %c0_i32, %c0_i32_0 : i32, i32
  }
  func.func @transform_11(%arg0: i32) -> (i32, i32) {
    %c0_i32 = arith.constant 0 : i32
    %c0_i32_0 = arith.constant 0 : i32
    %c0_i32_1 = arith.constant 0 : i32
    return %c0_i32, %c0_i32_0 : i32, i32
  }
  func.func @transform_12(%arg0: i32) -> (i32, i32) {
    %c0_i32 = arith.constant 0 : i32
    %c0_i32_0 = arith.constant 0 : i32
    %c0_i32_1 = arith.constant 0 : i32
    return %c0_i32, %c0_i32_0 : i32, i32
  }
  func.func @transform_13(%arg0: i32) -> (i32, i32) {
    %c0_i32 = arith.constant 0 : i32
    %c0_i32_0 = arith.constant 0 : i32
    %c0_i32_1 = arith.constant 0 : i32
    return %c0_i32, %c0_i32_0 : i32, i32
  }
}

</mosaic_0001>

<bundles_post_ra>
// kernel: tpu_custom_call.1
= control target key start
LH: loop header
LB: loop body
LE: loop exit
PB: predicated region body
PF: predicated region fallthrough
CT: control target
= control target key end

     0   :  { %s1587_s0 = inlined_call_operand.vmem [shape: s32[1,384], index: 0, kind: input, shape index: {}]   ;;  %s1588_s1 = inlined_call_operand.vmem [shape: s32[384,1], index: 1, kind: input, shape index: {}]   ;;  %s1589_s2 = inlined_call_operand.vmem [shape: s32[1,384], index: 2, kind: input, shape index: {}]   ;;  %s1590_s3 = inlined_call_operand.vmem [shape: f32[4,16], index: 3, kind: input, shape index: {}]   ;;  %s1591_s4 = inlined_call_operand.vmem [shape: f32[1,16], index: 4, kind: input, shape index: {}]   ;;  %s1592_s5 = inlined_call_operand.vmem [shape: f32[3,16], index: 5, kind: input, shape index: {}]   ;;  %s1593_s6 = inlined_call_operand.vmem [shape: f32[32,1], index: 6, kind: input, shape index: {}]   ;;  %s1594_s7 = inlined_call_operand.vmem [shape: f32[32,1], index: 7, kind: input, shape index: {}]   ;;  %s1595_s8 = inlined_call_operand.vmem [shape: f32[32,1], index: 8, kind: input, shape index: {}]   ;;  %s1596_s9 = inlined_call_operand.vmem [shape: f32[32,1], index: 9, kind: input, shape index: {}]   ;;  %s1597_s10 = inlined_call_operand.vmem [shape: f32[32,1], index: 10, kind: input, shape index: {}]   ;;  %s1598_s11 = inlined_call_operand.vmem [shape: f32[32,1], index: 11, kind: input, shape index: {}]   ;;  %s1599_s12 = inlined_call_operand.<no memory space> [shape: f32[1,1], index: 12, kind: input, shape index: {}]   ;;  %s1600_s13 = inlined_call_operand.hbm [shape: f32[3,16], index: 13, kind: output, shape index: {}]  }
   0x1   :  { %v18_v0 = vstv %s1599_s12 }
   0x2   :  { %19 = vst [vmem:[#allocation3] sm:$0x1] %v18_v0 }
   0x3   :  { %20 = vsyncpa [#allocation5], 0  ;;  %s1350_s27 = smov 0  }
   0x4 LB: > { %s1356_s28 = sadd.s32 4294967295, %s1268_s27   ;;  %p1092_p0 = scmp.ge.s32.totalorder %s1268_s27, 1  ;;  %s1268_s27 = sphi %s1350_s27, %s26_s27  }
   0x5   : > { %p402_p1 = scmp.lt.s32.totalorder %s1268_s27, 4 }
   0x7   : > { %p403_p2 = pnand %p1092_p0, %p402_p1 }
   0x8   : > { %p447_p3 = scmp.lt.s32.totalorder (!%p403_p2), %s1356_s28, 2  ;;  %s1093_s12 = sshll.u32 (!%p403_p2), %s1356_s28, 4 }
   0x9   : > { %406 = sbr.rel (%p403_p2) target bundleno = 689 (0x2b1), region = 72  ;;  %p451_p4 = scmp.lt.s32.totalorder (!%p403_p2), %s1093_s12, 47 }
   0xa   : > { %p1095_p5 = scmp.ne.s32.totalorder (!%p403_p2), %s1356_s28, 0 }
   0xe   : > { %s448_s29 = scalar_select %p447_p3, %s1356_s28, 2 }
   0xf   : > { %s1602_s12 = smov (!%p451_p4, %s1093_s12), 47  ;;  %462 = sbr.rel (%p1095_p5) target bundleno = 22 (0x16), region = 76 }
  0x10   : > { %s449_s15 = scalar_lea.vmem %s1587_s0, %s448_s29  ;;  %s458_s18 = scalar_lea.vmem %s1589_s2, %s448_s29 }
  0x11   : > { %s1094_s19 = sshll.u32 %s1602_s12, 3 }
  0x12   : > { %s1372_s22 = scalar_lea.vmem %s1588_s1, %s1094_s19 }
  0x14   : > { %vm463_vm0 = vcmask 125952   ;;  %v1270_v1 = vmov 0.0  }
  0x15   : > { %464 = vst.msk [vmem:[#allocation2] sm:$0xf] %vm463_vm0, %v1270_v1 }
  0x16 PF: > { %v468_v2 = vlaneseq  ;;  %v1271_v3 = vmov 0.0   ;;  %vm1272_vm1 = vmmov 0   ;;  %v583_v4 = vld [vmem:[%s1593_s6] sm:$0xff]  ;;  %v585_v5 = vld [vmem:[%s1593_s6 + $0x10] sm:$0xff]  ;;  %v1273_v7 = vmov 0   ;;  %v584_v11 = vld [vmem:[%s1593_s6 + $0x8] sm:$0xff] }
  0x17   : > { %1161 = vmatprep.subr.mxu0 %v1271_v3  ;;  %1165 = vmatprep.mubr.msk.f32.mxu0 %vm1272_vm1, %v1271_v3  ;;  %v1096_v8 = vld [vmem:[%s449_s15] ss:$0 sm:$0xff]  ;;  %v612_v19 = vld [vmem:[%s1594_s7 + $0x8] sm:$0xff]  ;;  %v586_v20 = vld [vmem:[%s1593_s6 + $0x18] sm:$0xff]  ;;  %vm493_vm6 = vcmask 130048   ;;  %v1274_v59 = vmov 1.0  }
  0x18   : > { %v1385_v6 = vshrl.u32 %v468_v2, 7  ;;  %1224 = vset.pattern.permute.xlu0 %v1273_v7  ;;  %1225 = vset.pattern.permute.xlu1 %v1273_v7  ;;  %v1099_v9 = vld [vmem:[%s458_s18] ss:$0 sm:$0xff]  ;;  %v613_v22 = vld [vmem:[%s1594_s7 + $0x10] sm:$0xff]  ;;  %v614_v23 = vld [vmem:[%s1594_s7 + $0x18] sm:$0xff]  ;;  %v1474_v55 = vand.u32 127, %v468_v2 }
  0x19   : > { %589 = vperm.xlu0 %1224, %v583_v4   ;;  %599 = vperm.xlu1 %1225, %v585_v5   ;;  %v611_v12 = vld [vmem:[%s1594_s7] sm:$0xff]  ;;  %v652_v25 = vld [vmem:[%s1595_s8 + $0x8] sm:$0xff]  ;;  %v653_v26 = vld [vmem:[%s1595_s8 + $0x10] sm:$0xff]  ;;  %p1135_p6 = scmp.ne.s32.totalorder %s1356_s28, 2 }
  0x1a   : > { %v470_v10 = vadd.s32 8, %v1385_v6  ;;  %vm475_vm2 = vcmp.eq.s32.totalorder %v1096_v8, %v1385_v6  ;;  %vm485_vm3 = vcmp.eq.s32.totalorder %v1099_v9, %v1385_v6  ;;  %1168 = vmatprep.subr.mxu1 %v1271_v3  ;;  %1200 = vmatprep.mubr.msk.f32.mxu1 %vm1272_vm1, %v1271_v3  ;;  %v1412_v21 = vld [vmem:[%s1590_s3] sm:$0xf]  ;;  %v654_v27 = vld [vmem:[%s1595_s8 + $0x18] sm:$0xff]  ;;  %v708_v29 = vld [vmem:[%s1372_s22 + $0x70] sm:$0xff] }
  0x1b   : > { %v1097_v13 = vsel %vm475_vm2, 1.0, %v1271_v3  ;;  %v1100_v14 = vsel %vm485_vm3, 1.0, %v1271_v3  ;;  %v651_v24 = vld [vmem:[%s1595_s8] sm:$0xff]  ;;  %v709_v28 = vld [vmem:[%s1372_s22 + $0x78] sm:$0xff]  ;;  %v707_v30 = vld [vmem:[%s1372_s22 + $0x68] sm:$0xff] }
  0x1c   : > { %vm476_vm4 = vcmp.eq.s32.totalorder %v1096_v8, %v470_v10  ;;  %vm486_vm5 = vcmp.eq.s32.totalorder %v1099_v9, %v470_v10  ;;  %v491_v18 = vsub.f32 %v1097_v13, %v1100_v14  ;;  %v706_v31 = vld [vmem:[%s1372_s22 + $0x60] sm:$0xff]  ;;  %v705_v32 = vld [vmem:[%s1372_s22 + $0x58] sm:$0xff]  ;;  %v704_v33 = vld [vmem:[%s1372_s22 + $0x50] sm:$0xff] }
  0x1d   : > { %v1098_v15 = vsel %vm476_vm4, 1.0, %v1271_v3  ;;  %v1101_v16 = vsel %vm486_vm5, 1.0, %v1271_v3  ;;  %594 = vperm.xlu0 %1224, %v584_v11   ;;  %617 = vperm.xlu1 %1225, %v611_v12   ;;  %v703_v34 = vld [vmem:[%s1372_s22 + $0x48] sm:$0xff]  ;;  %v702_v35 = vld [vmem:[%s1372_s22 + $0x40] sm:$0xff]  ;;  %v701_v36 = vld [vmem:[%s1372_s22 + $0x38] sm:$0xff] }
  0x1e   : > { %v492_v17 = vsub.f32 %v1098_v15, %v1101_v16  ;;  %v700_v37 = vld [vmem:[%s1372_s22 + $0x30] sm:$0xff]  ;;  %v699_v38 = vld [vmem:[%s1372_s22 + $0x28] sm:$0xff]  ;;  %v698_v39 = vld [vmem:[%s1372_s22 + $0x20] sm:$0xff] }
  0x1f   : > { %v697_v40 = vld [vmem:[%s1372_s22 + $0x18] sm:$0xff]  ;;  %v696_v41 = vld [vmem:[%s1372_s22 + $0x10] sm:$0xff]  ;;  %v695_v42 = vld [vmem:[%s1372_s22 + $0x8] sm:$0xff] }
  0x20   : > { %1162 = vmatpush3.msra.mxu0 %v492_v17  ;;  %v694_v43 = vld [vmem:[%s1372_s22] sm:$0xff] }
  0x21   : > { %1163 = vmatprep.subr.mxu0 %v1271_v3  ;;  %622 = vperm.xlu0 %1224, %v612_v19  }
  0x22   : > { %1164 = vmatpush3.msra.mxu0 %v491_v18  ;;  %604 = vperm.xlu1 %1225, %v586_v20  }
  0x23   : > { %1166 = vmatmul.mubr.msk.f32.vlgmr.msra.gmra.mxu0 %vm493_vm6, %v1412_v21 }
  0x25   : > { %627 = vperm.xlu0 %1224, %v613_v22  }
  0x26   : > { %632 = vperm.xlu1 %1225, %v614_v23  }
  0x29   : > { %657 = vperm.xlu0 %1224, %v651_v24  }
  0x2a   : > { %662 = vperm.xlu1 %1225, %v652_v25  }
  0x2d   : > { %667 = vperm.xlu0 %1224, %v653_v26  }
  0x2e   : > { %672 = vperm.xlu1 %1225, %v654_v27  }
  0x31   : > { %756 = vperm.xlu0 %1224, %v709_v28  }
  0x32   : > { %753 = vperm.xlu1 %1225, %v708_v29  }
  0x35   : > { %750 = vperm.xlu0 %1224, %v707_v30  }
  0x36   : > { %747 = vperm.xlu1 %1225, %v706_v31  }
  0x39   : > { %744 = vperm.xlu0 %1224, %v705_v32  }
  0x3a   : > { %741 = vperm.xlu1 %1225, %v704_v33  }
  0x3d   : > { %738 = vperm.xlu0 %1224, %v703_v34  }
  0x3e   : > { %735 = vperm.xlu1 %1225, %v702_v35  }
  0x41   : > { %732 = vperm.xlu0 %1224, %v701_v36  }
  0x42   : > { %729 = vperm.xlu1 %1225, %v700_v37  }
  0x45   : > { %726 = vperm.xlu0 %1224, %v699_v38  }
  0x46   : > { %723 = vperm.xlu1 %1225, %v698_v39  }
  0x49   : > { %720 = vperm.xlu0 %1224, %v697_v40  }
  0x4a   : > { %717 = vperm.xlu1 %1225, %v696_v41  }
  0x4d   : > { %714 = vperm.xlu0 %1224, %v695_v42  }
  0x4e   : > { %711 = vperm.xlu1 %1225, %v694_v43  }
  0x94   : > { %v1451_v44 = vpop.permute.xlu0 %589  ;;  %v1453_v45 = vpop.permute.xlu1 %599 }
  0x98   : > { %v1455_v46 = vpop.permute.xlu0 %594  ;;  %v1457_v47 = vpop.permute.xlu1 %617 }
  0x9c   : > { %v1459_v48 = vpop.permute.xlu0 %622 }
  0x9d   : > { %v1461_v49 = vpop.permute.xlu1 %604 }
  0xa0   : > { %v1463_v50 = vpop.permute.xlu0 %627 }
  0xa1   : > { %v1465_v51 = vpop.permute.xlu1 %632 }
  0xa4   : > { %v1467_v52 = vpop.permute.xlu0 %657 }
  0xa5   : > { %v1469_v53 = vpop.permute.xlu1 %662 }
  0xa8   : > { %v1471_v54 = vpop.permute.xlu0 %667 }
  0xa9   : > { %v1476_v56 = vpop.permute.xlu1 %672 }
  0xac   : > { %v757_v57 = vpop.permute.xlu0 %756 }
  0xad   : > { %vm773_vm7 = vcmp.eq.s32.totalorder %v757_v57, %v1474_v55  ;;  %v754_v58 = vpop.permute.xlu1 %753 }
  0xae   : > { %vm772_vm8 = vcmp.eq.s32.totalorder %v754_v58, %v1474_v55  ;;  %1169 = vmatpush3.msk.msra.mxu1 %vm773_vm7, %v1274_v59 }
  0xaf   : > { %1170 = vmatprep.subr.mxu1 %v1271_v3 }
  0xb0   : > { %v751_v60 = vpop.permute.xlu0 %750  ;;  %1171 = vmatpush3.msk.msra.mxu1 %vm772_vm8, %v1274_v59  ;;  %vm568_vm8 = vcmask 1043456  }
  0xb1   : > { %vm771_vm9 = vcmp.eq.s32.totalorder %v751_v60, %v1474_v55  ;;  %1172 = vmatprep.subr.mxu1 %v1271_v3  ;;  %v748_v61 = vpop.permute.xlu1 %747 }
  0xb2   : > { %vm770_vm10 = vcmp.eq.s32.totalorder %v748_v61, %v1474_v55  ;;  %1173 = vmatpush3.msk.msra.mxu1 %vm771_vm9, %v1274_v59  ;;  %v806_v61 = vld [vmem:[#allocation2] sm:$0xf] }
  0xb3   : > { %1174 = vmatprep.subr.mxu1 %v1271_v3 }
  0xb4   : > { %v745_v62 = vpop.permute.xlu0 %744  ;;  %1175 = vmatpush3.msk.msra.mxu1 %vm770_vm10, %v1274_v59 }
  0xb5   : > { %vm769_vm11 = vcmp.eq.s32.totalorder %v745_v62, %v1474_v55  ;;  %1176 = vmatprep.subr.mxu1 %v1271_v3  ;;  %v742_v63 = vpop.permute.xlu1 %741 }
  0xb6   : > { %vm768_vm12 = vcmp.eq.s32.totalorder %v742_v63, %v1474_v55  ;;  %1177 = vmatpush3.msk.msra.mxu1 %vm769_vm11, %v1274_v59 }
  0xb7   : > { %1178 = vmatprep.subr.mxu1 %v1271_v3 }
  0xb8   : > { %v739_v0 = vpop.permute.xlu0 %738  ;;  %1179 = vmatpush3.msk.msra.mxu1 %vm768_vm12, %v1274_v59 }
  0xb9   : > { %vm767_vm13 = vcmp.eq.s32.totalorder %v739_v0, %v1474_v55  ;;  %1180 = vmatprep.subr.mxu1 %v1271_v3  ;;  %v736_v1 = vpop.permute.xlu1 %735 }
  0xba   : > { %vm766_vm14 = vcmp.eq.s32.totalorder %v736_v1, %v1474_v55  ;;  %1181 = vmatpush3.msk.msra.mxu1 %vm767_vm13, %v1274_v59 }
  0xbb   : > { %1182 = vmatprep.subr.mxu1 %v1271_v3 }
  0xbc   : > { %v733_v2 = vpop.permute.xlu0 %732  ;;  %1183 = vmatpush3.msk.msra.mxu1 %vm766_vm14, %v1274_v59 }
  0xbd   : > { %vm765_vm15 = vcmp.eq.s32.totalorder %v733_v2, %v1474_v55  ;;  %1184 = vmatprep.subr.mxu1 %v1271_v3  ;;  %v730_v4 = vpop.permute.xlu1 %729 }
  0xbe   : > { %vm764_vm0 = vcmp.eq.s32.totalorder %v730_v4, %v1474_v55  ;;  %1185 = vmatpush3.msk.msra.mxu1 %vm765_vm15, %v1274_v59  ;;  %vm689_vm15 = vcmp.eq.s32.totalorder %v1385_v6, 3 }
  0xbf   : > { %1186 = vmatprep.subr.mxu1 %v1271_v3 }
  0xc0   : > { %v727_v5 = vpop.permute.xlu0 %726  ;;  %1187 = vmatpush3.msk.msra.mxu1 %vm764_vm0, %v1274_v59  ;;  %vm878_vm0 = vcmask 125952  }
  0xc1   : > { %vm763_vm1 = vcmp.eq.s32.totalorder %v727_v5, %v1474_v55  ;;  %1188 = vmatprep.subr.mxu1 %v1271_v3  ;;  %v724_v7 = vpop.permute.xlu1 %723 }
  0xc2   : > { %vm762_vm2 = vcmp.eq.s32.totalorder %v724_v7, %v1474_v55  ;;  %1189 = vmatpush3.msk.msra.mxu1 %vm763_vm1, %v1274_v59 }
  0xc3   : > { %1190 = vmatprep.subr.mxu1 %v1271_v3 }
  0xc4   : > { %v721_v8 = vpop.permute.xlu0 %720  ;;  %1191 = vmatpush3.msk.msra.mxu1 %vm762_vm2, %v1274_v59 }
  0xc5   : > { %vm761_vm3 = vcmp.eq.s32.totalorder %v721_v8, %v1474_v55  ;;  %1192 = vmatprep.subr.mxu1 %v1271_v3  ;;  %v718_v9 = vpop.permute.xlu1 %717 }
  0xc6   : > { %vm760_vm4 = vcmp.eq.s32.totalorder %v718_v9, %v1474_v55  ;;  %1193 = vmatpush3.msk.msra.mxu1 %vm761_vm3, %v1274_v59 }
  0xc7   : > { %1194 = vmatprep.subr.mxu1 %v1271_v3 }
  0xc8   : > { %v715_v10 = vpop.permute.xlu0 %714  ;;  %1195 = vmatpush3.msk.msra.mxu1 %vm760_vm4, %v1274_v59 }
  0xc9   : > { %vm759_vm5 = vcmp.eq.s32.totalorder %v715_v10, %v1474_v55  ;;  %1196 = vmatprep.subr.mxu1 %v1271_v3  ;;  %v712_v11 = vpop.permute.xlu1 %711 }
  0xca   : > { %vm758_vm7 = vcmp.eq.s32.totalorder %v712_v11, %v1474_v55  ;;  %1197 = vmatpush3.msk.msra.mxu1 %vm759_vm5, %v1274_v59 }
  0xcb   : > { %1198 = vmatprep.subr.mxu1 %v1271_v3 }
  0xcc   : > { %1199 = vmatpush3.msk.msra.mxu1 %vm758_vm7, %v1274_v59 }
  0xe3   : > { %v563_v12 = vpop.f32.mrf.mxu0 }
  0xe4   : > { %v567_v13 = vmul.f32 %v563_v12, %v563_v12 }
  0xe5   : > { %v1167_v14 = vpop.f32.mrf.mxu0 }
  0xe6   : > { %v569_v15 = vsel %vm568_vm8, %v567_v13, 0.0 }
  0xe7   : > { %v570_v16 = vrot.slane %v569_v15, 4 }
  0xe9   : > { %v571_v17 = vadd.f32 %v570_v16, %v569_v15 }
  0xeb   : > { %v572_v18 = vrot.slane %v571_v17, 2 }
  0xed   : > { %v573_v19 = vadd.f32 %v572_v18, %v571_v17 }
  0xef   : > { %v574_v20 = vrot.slane %v573_v19, 1 }
  0xf1   : > { %v575_v22 = vadd.f32 %v574_v20, %v573_v19 }
  0xf3   : > { %1226 = vrsqrt.f32 %v575_v22  ;;  %vm578_vm9 = vcmp.eq.f32.partialorder %v575_v22, inf  ;;  %v581_v25 = vand.u32 2147483648, %v575_v22  ;;  %vm580_vm10 = vcmp.eq.f32.partialorder %v575_v22, 0.0 }
 0x100   : > { %v1227_v23 = vpop.eup %1226 }
 0x101   : > { %v577_v24 = vmul.f32 %v1227_v23, %v575_v22 }
 0x103   : > { %v579_v26 = vsel %vm578_vm9, %v575_v22, %v577_v24 }
 0x104   : > { %v582_v3 = vsel %vm580_vm10, %v581_v25, %v579_v26 }
 0x105   : > { %v607_v27 = vmul.f32 %v1451_v44, %v582_v3  ;;  %v608_v28 = vmul.f32 %v1455_v46, %v582_v3  ;;  %v609_v29 = vmul.f32 %v1453_v45, %v582_v3  ;;  %v610_v30 = vmul.f32 %v1461_v49, %v582_v3 }
 0x107   : > { %v635_v31 = vadd.f32 %v1457_v47, %v607_v27  ;;  %v636_v32 = vadd.f32 %v1459_v48, %v608_v28  ;;  %v637_v33 = vadd.f32 %v1463_v50, %v609_v29  ;;  %v638_v34 = vadd.f32 %v1465_v51, %v610_v30 }
 0x109   : > { %vm639_vm11 = vcmp.gt.f32.partialorder %v635_v31, 0.0  ;;  %vm640_vm12 = vcmp.gt.f32.partialorder %v636_v32, 0.0  ;;  %vm641_vm13 = vcmp.gt.f32.partialorder %v637_v33, 0.0  ;;  %v643_v35 = vmul.f32 0.2, %v635_v31 }
 0x10a   : > { %v644_v36 = vmul.f32 0.2, %v636_v32  ;;  %v645_v37 = vmul.f32 0.2, %v637_v33  ;;  %vm642_vm14 = vcmp.gt.f32.partialorder %v638_v34, 0.0 }
 0x10b   : > { %v646_v38 = vmul.f32 0.2, %v638_v34  ;;  %v647_v39 = vsel %vm639_vm11, %v635_v31, %v643_v35 }
 0x10c   : > { %v648_v40 = vsel %vm640_vm12, %v636_v32, %v644_v36  ;;  %v649_v41 = vsel %vm641_vm13, %v637_v33, %v645_v37  ;;  %v675_v42 = vmul.f32 %v1467_v52, %v647_v39 }
 0x10d   : > { %v676_v43 = vmul.f32 %v1469_v53, %v648_v40  ;;  %v650_v44 = vsel %vm642_vm14, %v638_v34, %v646_v38  ;;  %v677_v45 = vmul.f32 %v1471_v54, %v649_v41 }
 0x10e   : > { %v678_v47 = vmul.f32 %v1476_v56, %v650_v44 }
 0x10f   : > { %v679_v46 = vadd.f32 %v676_v43, %v675_v42 }
 0x111   : > { %v680_v48 = vadd.f32 %v679_v46, %v677_v45 }
 0x113   : > { %v681_v49 = vadd.f32 %v680_v48, %v678_v47 }
 0x115   : > { %v682_v50 = vrot.slane %v681_v49, 4 }
 0x117   : > { %v683_v51 = vadd.f32 %v682_v50, %v681_v49 }
 0x119   : > { %v684_v55 = vrot.slane %v683_v51, 2 }
 0x11b   : > { %v685_v57 = vadd.f32 %v684_v55, %v683_v51 }
 0x11d   : > { %v686_v58 = vrot.slane %v685_v57, 1 }
 0x11f   : > { %v687_v59 = vadd.f32 %v686_v58, %v685_v57 }
 0x121   : > { %1228 = vtanh.f32 %v687_v59 }
 0x12e   : > { %v1229_v60 = vpop.eup %1228 }
 0x12f   : > { %v690_v52 = vmul.f32 %v1229_v60, %v563_v12 }
 0x131   : > { %v691_v53 = vsel %vm689_vm15, 1.0, %v690_v52 }
 0x132   : > { %1201 = vmatmul.mubr.f32.vlgmr.msra.gmra.mxu1 %v691_v53 }
 0x1f1   : > { %883 = sbr.rel (%p1135_p6) target bundleno = 674 (0x2a2), region = 80 }
 0x1f2   : > { %v873_v54 = vpop.f32.mrf.mxu1 }
 0x1f3   : > { %v877_v62 = vadd.f32 %v873_v54, %v806_v61 }
 0x1f4   : > { %v1202_v56 = vpop.f32.mrf.mxu1 }
 0x1f5   : > { %879 = vst.msk [vmem:[#allocation2] sm:$0xf] %vm878_vm0, %v877_v62 }
 0x1f6   : > { %v896_v63 = vld [vmem:[%s1596_s9 + $0x10] sm:$0xff]  ;;  %v894_v0 = vld [vmem:[%s1596_s9] sm:$0xff]  ;;  %v1275_v1 = vmov 0   ;;  %v895_v4 = vld [vmem:[%s1596_s9 + $0x8] sm:$0xff]  ;;  %v888_v30 = vsub.s32 3, %v1385_v6 }
 0x1f7   : > { %1231 = vset.pattern.permute.xlu1 %v1275_v1  ;;  %1230 = vset.pattern.permute.xlu0 %v1275_v1  ;;  %v928_v2 = vld [vmem:[%s1597_s10] sm:$0xff]  ;;  %v897_v5 = vld [vmem:[%s1596_s9 + $0x18] sm:$0xff]  ;;  %v929_v7 = vld [vmem:[%s1597_s10 + $0x8] sm:$0xff] }
 0x1f8   : > { %910 = vperm.xlu1 %1231, %v896_v63   ;;  %900 = vperm.xlu0 %1230, %v894_v0   ;;  %v931_v8 = vld [vmem:[%s1597_s10 + $0x18] sm:$0xff]  ;;  %v930_v9 = vld [vmem:[%s1597_s10 + $0x10] sm:$0xff]  ;;  %v969_v10 = vld [vmem:[%s1598_s11 + $0x8] sm:$0xff]  ;;  %v1017_v63 = vsub.s32 0, %v1385_v6 }
 0x1f9   : > { %v968_v11 = vld [vmem:[%s1598_s11] sm:$0xff]  ;;  %v971_v12 = vld [vmem:[%s1598_s11 + $0x18] sm:$0xff]  ;;  %v970_v13 = vld [vmem:[%s1598_s11 + $0x10] sm:$0xff] }
 0x1fa   : > { %v1009_v14 = vld [vmem:[#allocation3] sm:$0x1]  ;;  %v1136_v17 = vld [vmem:[%s1591_s4] ss:$0 sm:$0xff] }
 0x1fc   : > { %934 = vperm.xlu1 %1231, %v928_v2   ;;  %905 = vperm.xlu0 %1230, %v895_v4   ;;  %v884_v26 = vld [vmem:[#allocation2] sm:$0xf] }
 0x1fd   : > { %v885_v29 = vmax.f32 %v884_v26, 1.0 }
 0x1ff   : > { %v889_v37 = vrot.slane %v885_v29, %v888_v30 }
 0x200   : > { %915 = vperm.xlu1 %1231, %v897_v5   ;;  %939 = vperm.xlu0 %1230, %v929_v7  }
 0x201   : > { %1232 = vrcp.f32 %v889_v37 }
 0x204   : > { %949 = vperm.xlu1 %1231, %v931_v8   ;;  %944 = vperm.xlu0 %1230, %v930_v9   ;;  %v1020_v8 = vld [vmem:[%s1592_s5] sm:$0x7] }
 0x208   : > { %979 = vperm.xlu1 %1231, %v969_v10   ;;  %974 = vperm.xlu0 %1230, %v968_v11  }
 0x20c   : > { %989 = vperm.xlu1 %1231, %v971_v12   ;;  %984 = vperm.xlu0 %1230, %v970_v13  }
 0x20e   : > { %v1233_v56 = vpop.eup %1232 }
 0x20f   : > { %v891_v2 = vmul.f32 %v1233_v56, %v884_v26 }
 0x210   : > { %1012 = vperm.xlu0 %1230, %v1009_v14  }
 0x211   : > { %v892_v9 = vadd.f32 %v891_v2, %v1412_v21 }
 0x273   : > { %v911_v15 = vpop.permute.xlu1 %910  ;;  %v901_v16 = vpop.permute.xlu0 %900 }
 0x274   : > { %v924_v20 = vmul.f32 %v1136_v17, %v901_v16  ;;  %v926_v27 = vmul.f32 %v1136_v17, %v911_v15 }
 0x277   : > { %v935_v18 = vpop.permute.xlu1 %934  ;;  %v906_v19 = vpop.permute.xlu0 %905 }
 0x278   : > { %v925_v22 = vmul.f32 %v1136_v17, %v906_v19  ;;  %v952_v23 = vadd.f32 %v935_v18, %v924_v20 }
 0x27a   : > { %v960_v31 = vmul.f32 0.2, %v952_v23  ;;  %vm956_vm2 = vcmp.gt.f32.partialorder %v952_v23, 0.0 }
 0x27b   : > { %v916_v24 = vpop.permute.xlu1 %915  ;;  %v940_v25 = vpop.permute.xlu0 %939 }
 0x27c   : > { %v953_v3 = vadd.f32 %v940_v25, %v925_v22  ;;  %v927_v28 = vmul.f32 %v1136_v17, %v916_v24  ;;  %v964_v43 = vsel %vm956_vm2, %v952_v23, %v960_v31 }
 0x27e   : > { %v961_v32 = vmul.f32 0.2, %v953_v3  ;;  %vm957_vm1 = vcmp.gt.f32.partialorder %v953_v3, 0.0 }
 0x27f   : > { %v950_v33 = vpop.permute.xlu1 %949  ;;  %v945_v34 = vpop.permute.xlu0 %944 }
 0x280   : > { %v955_v35 = vadd.f32 %v950_v33, %v927_v28  ;;  %v954_v36 = vadd.f32 %v945_v34, %v926_v27  ;;  %v965_v41 = vsel %vm957_vm1, %v953_v3, %v961_v32 }
 0x282   : > { %v963_v38 = vmul.f32 0.2, %v955_v35  ;;  %v962_v39 = vmul.f32 0.2, %v954_v36  ;;  %vm959_vm3 = vcmp.gt.f32.partialorder %v955_v35, 0.0  ;;  %vm958_vm4 = vcmp.gt.f32.partialorder %v954_v36, 0.0 }
 0x283   : > { %v980_v40 = vpop.permute.xlu1 %979  ;;  %v975_v42 = vpop.permute.xlu0 %974 }
 0x284   : > { %v993_v44 = vmul.f32 %v980_v40, %v965_v41  ;;  %v992_v45 = vmul.f32 %v975_v42, %v964_v43  ;;  %v967_v49 = vsel %vm959_vm3, %v955_v35, %v963_v38  ;;  %v966_v51 = vsel %vm958_vm4, %v954_v36, %v962_v39 }
 0x286   : > { %v997_v46 = vsel %vm493_vm6, %v993_v44, 0.0  ;;  %v996_v47 = vsel %vm493_vm6, %v992_v45, 0.0 }
 0x287   : > { %v990_v48 = vpop.permute.xlu1 %989  ;;  %v985_v50 = vpop.permute.xlu0 %984  ;;  %v998_v58 = vadd.f32 %v997_v46, %v996_v47 }
 0x288   : > { %v995_v55 = vmul.f32 %v990_v48, %v967_v49  ;;  %v994_v57 = vmul.f32 %v985_v50, %v966_v51 }
 0x28a   : > { %v999_v59 = vsel %vm493_vm6, %v994_v57, 0.0  ;;  %v1001_v52 = vsel %vm493_vm6, %v995_v55, 0.0  ;;  %vm1023_vm6 = vcmask 124928  }
 0x28b   : > { %v1000_v60 = vadd.f32 %v999_v59, %v998_v58  ;;  %v1013_v1 = vpop.permute.xlu0 %1012 }
 0x28c   : > { %v1018_v7 = vrot.slane %v1013_v1, %v1017_v63 }
 0x28d   : > { %v1002_v53 = vadd.f32 %v1001_v52, %v1000_v60 }
 0x28f   : > { %v1003_v61 = vrot.slane %v1002_v53, 4 }
 0x291   : > { %v1004_v54 = vadd.f32 %v1003_v61, %v1002_v53 }
 0x293   : > { %v1005_v62 = vrot.slane %v1004_v54, 2 }
 0x295   : > { %v1006_v0 = vadd.f32 %v1005_v62, %v1004_v54 }
 0x297   : > { %v1007_v4 = vrot.slane %v1006_v0, 1 }
 0x299   : > { %v1008_v5 = vadd.f32 %v1007_v4, %v1006_v0 }
 0x29b   : > { %v1019_v10 = vadd.f32 %v1018_v7, %v1008_v5 }
 0x29d   : > { %v1021_v11 = vmul.f32 %v1020_v8, %v1019_v10 }
 0x29f   : > { %v1022_v12 = vadd.f32 %v1021_v11, %v892_v9 }
 0x2a1   : > { %1024 = vst.msk [vmem:[#allocation4] sm:$0x7] %vm1023_vm6, %v1022_v12 }
 0x2a2 PF: > { %p1207_p7 = scmp.eq.s32.totalorder %s1356_s28, 2  ;;  %s1276_s14 = smov [#allocation4]  }
 0x2a3   : > { %s1032_s15 = sshll.u32 %s1276_s14, 4  ;;  %s1033_s15 = int_to_ptr.vmem [resolvable:$true] %s1032_s15 }
 0x2a4   : > { %s1234_s16 = scalar_lea.vmem %s1033_s15, 64  ;;  %p1241_p11 = scmp.lt.s32.totalorder %s1033_s15, %s1033_s15 }
 0x2a5   : > { %p1235_p8 = scmp.ne.s32.totalorder %s1033_s15, %s1234_s16  ;;  %p1242_p12 = scmp.lt.s32.totalorder %s1234_s16, %s1234_s16 }
 0x2a7   : > { %p1236_p9 = pnand %p1235_p8, %p1207_p7  ;;  %p1243_p13 = por %p1242_p12, %p1241_p11 }
 0x2a9   : > { %p1237_p10 = pneg %p1236_p9 }
 0x2ab   : > { %p1244_p0 = pnand %p1243_p13, %p1237_p10 }
 0x2ad   : > { %1247 = shalt.err (!%p1244_p0)
}
 0x2ae   : > { %1204 = dma.vmem_to_hbm [thread:$0]  (%p1207_p7), %s1033_s15, 64, %s1600_s13, [#allocation5]  }
 0x2af   : > { %1263 = dma.done.wait (%p1207_p7), [#allocation5], 64  }
 0x2b0   : > { %1265 = vsyncadd (%p1207_p7), [#allocation5], 4294967232 }
 0x2b1 PF: > { %s26_s27 = sadd.s32 1, %s1268_s27  }
 0x2b2   : > { %p23_p1 = scmp.ge.s32.totalorder %s26_s27, 5  }
 0x2b4   :  { %25 = sbr.rel (!%p23_p1) target bundleno = 4 (0x4), region = 113 }
 0x2b9   :  { %1045 = vsyncpa [#allocation5], 1 }
 0x2ba   :  { %1047 = vsyncpa [#allocation5 + $0x1], 1 }

</bundles_post_ra>
